<compile_context>
chip_gen: v7x
topology: tpu7x:2x2x1
jax: 0.10.0
libtpu: 0.0.40
codegen_flags: <defaults>
</compile_context>

<pallas_src>
import jax
import jax.numpy as jnp
from jax.experimental import pallas as pl
from jax.experimental.pallas import tpu as pltpu


def _round_up(x, m):
    return ((x + m - 1) // m) * m


def _gru_cell_kernel(a_ref, w_ref, b_ref, h_out_ref):
    """One GRUCell step on a (TB, H+I) batch tile.

    a_ref: (TB, H+I)  concatenated [h | x] activations (compute dtype)
    w_ref: (H+I, N)   fused gate weights, N = round_up(4H, 128):
                      lane blocks [r | z | gi_n | gh_n] (compute dtype)
    b_ref: (1, N)     fused biases [b_ir+b_hr | b_iz+b_hz | b_in | b_hn], f32
    """
    H = h_out_ref.shape[-1]

    a = a_ref[...]                                            # (TB, H+I)
    # Single full-width MXU push, f32 accumulation.
    g = jnp.dot(a, w_ref[...], preferred_element_type=jnp.float32) + b_ref[...]

    r = jax.nn.sigmoid(g[:, 0 * H:1 * H])
    z = jax.nn.sigmoid(g[:, 1 * H:2 * H])
    n = jnp.tanh(g[:, 2 * H:3 * H] + r * g[:, 3 * H:4 * H])

    h = a[:, 0:H].astype(jnp.float32)                         # lane-aligned h slice
    # H=32 < 128 lanes -> masked partial store; accepted at this size.
    h_out_ref[...] = ((1.0 - z) * n + z * h).astype(h_out_ref.dtype)


def prepare_gru_params(w_ih, w_hh, b_ih, b_hh, *, compute_dtype=jnp.float32):
    """One-time parameter prep (hoisted out of the per-step forward path).

    Inputs use PyTorch nn.GRUCell layout / gate order (r, z, n):
      w_ih: (3H, I), w_hh: (3H, H), b_ih / b_hh: (3H,)
    Returns:
      w: (H+I, N) compute_dtype fused gate weights (N = round_up(4H, 128))
      b: (1, N)   float32 fused biases
    """
    w_ih = jnp.asarray(w_ih, jnp.float32)
    w_hh = jnp.asarray(w_hh, jnp.float32)
    b_ih = jnp.asarray(b_ih, jnp.float32)
    b_hh = jnp.asarray(b_hh, jnp.float32)

    H = w_hh.shape[-1]
    I = w_ih.shape[-1]
    K = H + I
    N = max(128, _round_up(4 * H, 128))

    wi = w_ih.reshape(3, H, I).transpose(0, 2, 1)   # (3, I, H): x @ W_i*
    wh = w_hh.reshape(3, H, H).transpose(0, 2, 1)   # (3, H, H): h @ W_h*

    # Activation layout is [h | x]: rows 0:H multiply h, rows H:H+I multiply x.
    w = jnp.zeros((K, N), jnp.float32)
    w = w.at[:H, 0 * H:1 * H].set(wh[0])   # r:    h @ W_hr
    w = w.at[H:, 0 * H:1 * H].set(wi[0])   #       x @ W_ir
    w = w.at[:H, 1 * H:2 * H].set(wh[1])   # z:    h @ W_hz
    w = w.at[H:, 1 * H:2 * H].set(wi[1])   #       x @ W_iz
    w = w.at[H:, 2 * H:3 * H].set(wi[2])   # gi_n: x @ W_in
    w = w.at[:H, 3 * H:4 * H].set(wh[2])   # gh_n: h @ W_hn (scaled by r later)

    bi = b_ih.reshape(3, H)
    bh = b_hh.reshape(3, H)
    b = jnp.zeros((1, N), jnp.float32)
    b = b.at[0, 0 * H:1 * H].set(bi[0] + bh[0])   # b_r (pre-summed)
    b = b.at[0, 1 * H:2 * H].set(bi[1] + bh[1])   # b_z (pre-summed)
    b = b.at[0, 2 * H:3 * H].set(bi[2])           # b_in
    b = b.at[0, 3 * H:4 * H].set(bh[2])           # b_hn

    return w.astype(compute_dtype), b


def encoder_forward(x, h_in, w, b, *, compute_dtype=jnp.float32,
                    batch_tile=2048, out_dtype=None):
    """Pallas equivalent of Encoder.forward: flatten leading dims, run GRUCell.

    x:    (..., input_size)
    h_in: (B, hidden) with B == prod of x's leading dims
    w/b:  prepared by prepare_gru_params().
    """
    I = x.shape[-1]
    H = h_in.shape[-1]
    K = H + I
    N = w.shape[-1]
    out_dtype = compute_dtype if out_dtype is None else out_dtype

    x2d = x.reshape(-1, I)                                   # x.view(-1, I)
    B = x2d.shape[0]
    # Single concatenated activation stream [h | x]: one DMA per batch tile.
    a = jnp.concatenate(
        [h_in.astype(compute_dtype), x2d.astype(compute_dtype)], axis=-1)

    # ---- batch tile selection ------------------------------------------------
    cd_bytes = jnp.dtype(compute_dtype).itemsize
    out_bytes = jnp.dtype(out_dtype).itemsize
    tb = _round_up(min(batch_tile, _round_up(B, 8)), 8)
    # VMEM safety clamp: double-buffered (in + out) tiles kept under ~8 MiB so
    # even huge caller tiles stay inside scoped VMEM on every generation
    # (16 MiB v5e, 32 MiB v6e/v7x; v7x physical VMEM is only 64 MiB).
    bytes_per_row = 2 * (K * cd_bytes + H * out_bytes)
    max_tb = max(8, ((8 * 1024 * 1024) // bytes_per_row) // 8 * 8)
    tb = min(tb, max_tb)
    # Ensure >=2 grid steps for non-trivial batches so the "parallel" axis can
    # shard across v7x's two TensorCores (harmless on single-TC v5e/v6e).
    if B >= 16 and _round_up(B, tb) // tb == 1:
        tb = _round_up(pl.cdiv(_round_up(B, 8), 2), 8)

    B_pad = _round_up(B, tb)
    if B_pad != B:
        a = jnp.pad(a, ((0, B_pad - B), (0, 0)))
    grid = (B_pad // tb,)

    cost = pl.CostEstimate(
        flops=2 * B_pad * K * N,
        transcendentals=3 * B_pad * H,
        bytes_accessed=(B_pad * K * cd_bytes + B_pad * H * out_bytes
                        + w.size * jnp.dtype(w.dtype).itemsize + b.size * 4),
    )

    h_out = pl.pallas_call(
        _gru_cell_kernel,
        out_shape=jax.ShapeDtypeStruct((B_pad, H), out_dtype),
        grid=grid,
        in_specs=[
            pl.BlockSpec((tb, K), lambda i: (i, 0)),     # [h | x] batch tile
            pl.BlockSpec((K, N), lambda i: (0, 0)),      # fused weights (VMEM-resident)
            pl.BlockSpec((1, N), lambda i: (0, 0)),      # fused biases  (VMEM-resident)
        ],
        out_specs=pl.BlockSpec((tb, H), lambda i: (i, 0)),
        compiler_params=pltpu.CompilerParams(
            dimension_semantics=("parallel",),
        ),
        cost_estimate=cost,
    )(a, w, b)

    return h_out[:B] if B_pad != B else h_out


def gru_reference(x, h_in, w_ih, w_hh, b_ih, b_hh):
    """Pure-JAX reference (PyTorch GRUCell semantics) for validation."""
    x2d = x.reshape(-1, x.shape[-1]).astype(jnp.float32)
    h_in = h_in.astype(jnp.float32)
    H = h_in.shape[-1]
    gi = x2d @ w_ih.T + b_ih
    gh = h_in @ w_hh.T + b_hh
    i_r, i_z, i_n = gi[:, :H], gi[:, H:2 * H], gi[:, 2 * H:]
    h_r, h_z, h_n = gh[:, :H], gh[:, H:2 * H], gh[:, 2 * H:]
    r = jax.nn.sigmoid(i_r + h_r)
    z = jax.nn.sigmoid(i_z + h_z)
    n = jnp.tanh(i_n + r * h_n)
    return (1.0 - z) * n + z * h_in


if __name__ == "__main__":
    # Shapes consistent with the module: Encoder(input_size=16, hidden_size=32)
    input_size = 16
    hidden_size = 32
    batch, seq = 2, 4          # x has extra leading dims; forward flattens them
    B = batch * seq            # effective GRUCell batch = 8

    key = jax.random.PRNGKey(0)
    kx, kh, k1, k2, k3, k4, kx2, kh2 = jax.random.split(key, 8)

    bound = 1.0 / (hidden_size ** 0.5)
    w_ih = jax.random.uniform(k1, (3 * hidden_size, input_size), jnp.float32, -bound, bound)
    w_hh = jax.random.uniform(k2, (3 * hidden_size, hidden_size), jnp.float32, -bound, bound)
    b_ih = jax.random.uniform(k3, (3 * hidden_size,), jnp.float32, -bound, bound)
    b_hh = jax.random.uniform(k4, (3 * hidden_size,), jnp.float32, -bound, bound)

    x = jax.random.normal(kx, (batch, seq, input_size), jnp.float32)
    h_in = jax.random.normal(kh, (B, hidden_size), jnp.float32)

    ref = gru_reference(x, h_in, w_ih, w_hh, b_ih, b_hh)

    # ---- f32 path (default), small batch, single grid step -----------------
    w_f32, b_f32 = prepare_gru_params(w_ih, w_hh, b_ih, b_hh)
    h_out = encoder_forward(x, h_in, w_f32, b_f32)
    h_out = jax.block_until_ready(h_out)
    assert h_out.shape == (B, hidden_size)
    assert jnp.allclose(h_out, ref, atol=5e-5, rtol=5e-5), "f32 mismatch vs reference"

    # ---- larger batch exercising the tiled grid (+padding, parallel axis) --
    B2 = 200                                     # not a multiple of the tile
    x2 = jax.random.normal(kx2, (B2, input_size), jnp.float32)
    h2 = jax.random.normal(kh2, (B2, hidden_size), jnp.float32)
    ref2 = gru_reference(x2, h2, w_ih, w_hh, b_ih, b_hh)

    h_out2 = encoder_forward(x2, h2, w_f32, b_f32, batch_tile=64)
    h_out2 = jax.block_until_ready(h_out2)
    assert h_out2.shape == (B2, hidden_size)
    assert jnp.allclose(h_out2, ref2, atol=5e-5, rtol=5e-5), "tiled f32 mismatch"

    # Same batch at the (auto-split >=2 steps) default tile size.
    h_out2b = encoder_forward(x2, h2, w_f32, b_f32)
    h_out2b = jax.block_until_ready(h_out2b)
    assert jnp.allclose(h_out2b, ref2, atol=5e-5, rtol=5e-5), "default-tile f32 mismatch"

    # ---- bf16 activations/weights/output (v6e/v7x friendly), f32 gate math --
    w_bf, b_bf = prepare_gru_params(w_ih, w_hh, b_ih, b_hh,
                                    compute_dtype=jnp.bfloat16)
    h_out_bf = encoder_forward(x, h_in, w_bf, b_bf, compute_dtype=jnp.bfloat16)
    h_out_bf = jax.block_until_ready(h_out_bf)
    assert h_out_bf.dtype == jnp.bfloat16
    assert jnp.allclose(h_out_bf.astype(jnp.float32), ref, atol=3e-2, rtol=3e-2), \
        "bf16 mismatch"

    print("KERNEL_OK")
</pallas_src>

<mosaic_0001>
module attributes {stable_mosaic.version = 11 : i64} {
  func.func @_gru_cell_kernel(%arg0: i32, %arg1: memref<8x48xf32, #tpu.memory_space<vmem>>, %arg2: memref<48x128xf32, #tpu.memory_space<vmem>>, %arg3: memref<1x128xf32, #tpu.memory_space<vmem>>, %arg4: memref<8x32xf32, #tpu.memory_space<vmem>>) attributes {dimension_semantics = [#tpu.dimension_semantics<parallel>], iteration_bounds = array<i64: 1>, scalar_prefetch = 0 : i64, scratch_operands = 0 : i64, tpu.core_type = #tpu.core_type<tc>, window_params = [{transform_indices = @transform_0, window_bounds = array<i64: 8, 48>}, {pipeline_mode = #tpu.pipeline_mode<synchronous>, transform_indices = @transform_1, window_bounds = array<i64: 48, 128>}, {pipeline_mode = #tpu.pipeline_mode<synchronous>, transform_indices = @transform_2, window_bounds = array<i64: 1, 128>}, {transform_indices = @transform_3, window_bounds = array<i64: 8, 32>}]} {
    %c0 = arith.constant 0 : index
    %c0_0 = arith.constant 0 : index
    %0 = vector.load %arg1[%c0, %c0_0] : memref<8x48xf32, #tpu.memory_space<vmem>>, vector<8x48xf32>
    %c0_1 = arith.constant 0 : index
    %c0_2 = arith.constant 0 : index
    %1 = vector.load %arg2[%c0_1, %c0_2] : memref<48x128xf32, #tpu.memory_space<vmem>>, vector<48x128xf32>
    %cst = arith.constant dense<0.000000e+00> : vector<8x128xf32>
    %2 = tpu.matmul %0, %1, %cst {dimension_numbers = #tpu.dot_dimension_numbers<[1], [0], [0], [1], [0, 0, 1, 1], [], []>} : vector<8x48xf32>, vector<48x128xf32>, vector<8x128xf32> -> vector<8x128xf32>
    %c0_3 = arith.constant 0 : index
    %c0_4 = arith.constant 0 : index
    %3 = vector.load %arg3[%c0_3, %c0_4] : memref<1x128xf32, #tpu.memory_space<vmem>>, vector<1x128xf32>
    %4 = vector.broadcast %3 : vector<1x128xf32> to vector<8x128xf32>
    %5 = arith.addf %2, %4 : vector<8x128xf32>
    %6 = vector.extract_strided_slice %5 {offsets = [0, 0], sizes = [8, 32], strides = [1, 1]} : vector<8x128xf32> to vector<8x32xf32>
    %7 = arith.negf %6 : vector<8x32xf32>
    %8 = math.exp %7 : vector<8x32xf32>
    %cst_5 = arith.constant 1.000000e+00 : f32
    %9 = vector.broadcast %cst_5 : f32 to vector<8x32xf32>
    %10 = arith.addf %9, %8 : vector<8x32xf32>
    %11 = arith.divf %9, %10 : vector<8x32xf32>
    %12 = vector.extract_strided_slice %5 {offsets = [0, 32], sizes = [8, 32], strides = [1, 1]} : vector<8x128xf32> to vector<8x32xf32>
    %13 = arith.negf %12 : vector<8x32xf32>
    %14 = math.exp %13 : vector<8x32xf32>
    %cst_6 = arith.constant 1.000000e+00 : f32
    %15 = vector.broadcast %cst_6 : f32 to vector<8x32xf32>
    %16 = arith.addf %15, %14 : vector<8x32xf32>
    %17 = arith.divf %15, %16 : vector<8x32xf32>
    %18 = vector.extract_strided_slice %5 {offsets = [0, 64], sizes = [8, 32], strides = [1, 1]} : vector<8x128xf32> to vector<8x32xf32>
    %19 = vector.extract_strided_slice %5 {offsets = [0, 96], sizes = [8, 32], strides = [1, 1]} : vector<8x128xf32> to vector<8x32xf32>
    %20 = arith.mulf %11, %19 : vector<8x32xf32>
    %21 = arith.addf %18, %20 : vector<8x32xf32>
    %22 = math.tanh %21 : vector<8x32xf32>
    %23 = vector.extract_strided_slice %0 {offsets = [0, 0], sizes = [8, 32], strides = [1, 1]} : vector<8x48xf32> to vector<8x32xf32>
    %cst_7 = arith.constant 1.000000e+00 : f32
    %24 = vector.broadcast %cst_7 : f32 to vector<8x32xf32>
    %25 = arith.subf %24, %17 : vector<8x32xf32>
    %26 = arith.mulf %25, %22 : vector<8x32xf32>
    %27 = arith.mulf %17, %23 : vector<8x32xf32>
    %28 = arith.addf %26, %27 : vector<8x32xf32>
    %c0_8 = arith.constant 0 : index
    %c0_9 = arith.constant 0 : index
    %29 = vector.load %arg4[%c0_8, %c0_9] : memref<8x32xf32, #tpu.memory_space<vmem>>, vector<8x32xf32>
    tpu.vector_store %arg4[%c0_8, %c0_9], %28 {strides = array<i32>} : memref<8x32xf32, #tpu.memory_space<vmem>>, vector<8x32xf32>,
    return
  }
  func.func @transform_0(%arg0: i32) -> (i32, i32) {
    %c0_i32 = arith.constant 0 : i32
    %c0_i32_0 = arith.constant 0 : i32
    return %arg0, %c0_i32 : i32, i32
  }
  func.func @transform_1(%arg0: i32) -> (i32, i32) {
    %c0_i32 = arith.constant 0 : i32
    %c0_i32_0 = arith.constant 0 : i32
    %c0_i32_1 = arith.constant 0 : i32
    return %c0_i32, %c0_i32_0 : i32, i32
  }
  func.func @transform_2(%arg0: i32) -> (i32, i32) {
    %c0_i32 = arith.constant 0 : i32
    %c0_i32_0 = arith.constant 0 : i32
    %c0_i32_1 = arith.constant 0 : i32
    return %c0_i32, %c0_i32_0 : i32, i32
  }
  func.func @transform_3(%arg0: i32) -> (i32, i32) {
    %c0_i32 = arith.constant 0 : i32
    %c0_i32_0 = arith.constant 0 : i32
    return %arg0, %c0_i32 : i32, i32
  }
}

</mosaic_0001>

<bundles_post_ra>
// kernel: tpu_custom_call.1
= control target key start
LH: loop header
LB: loop body
LE: loop exit
PB: predicated region body
PF: predicated region fallthrough
CT: control target
= control target key end

     0   :  { %8 = vsyncpa [#allocation3], 0  ;;  %s379_s0 = inlined_call_operand.hbm [shape: f32[8,48], index: 0, kind: input, shape index: {}]   ;;  %s380_s1 = inlined_call_operand.hbm [shape: f32[48,128], index: 1, kind: input, shape index: {}]   ;;  %s381_s2 = inlined_call_operand.vmem [shape: f32[1,128], index: 2, kind: input, shape index: {}]   ;;  %s382_s3 = inlined_call_operand.hbm [shape: f32[8,32], index: 3, kind: output, shape index: {}]  }
   0x1   :  { %9 = vsyncpa [#allocation6], 0 }
   0x2   :  { %10 = vsyncpa [#allocation4], 0  ;;  %s302_s12 = smov [#allocation2]   ;;  %s303_s14 = smov [#allocation5]  }
   0x3   :  { %s17_s13 = sshll.u32 %s302_s12, 4  ;;  %s26_s15 = sshll.u32 %s303_s14, 4  ;;  %s18_s13 = int_to_ptr.vmem [resolvable:$true] %s17_s13  ;;  %s333_s15 = int_to_ptr.vmem [resolvable:$true] %s26_s15 }
   0x4   :  { %s230_s18 = scalar_lea.hbm %s379_s0, 128 }
   0x5   :  { %p231_p0 = scmp.ne.s32.totalorder %s379_s0, %s230_s18  ;;  %p234_p1 = scmp.lt.u32.totalorder %s230_s18, %s379_s0 }
   0x7   :  { %p236_p2 = pnand %p234_p1, %p231_p0 }
   0x9   :  { %239 = shalt.err (!%p236_p2)
}
   0xa   :  { %s240_s23 = scalar_lea.vmem %s18_s13, 128  ;;  %p245_p4 = scmp.lt.s32.totalorder %s18_s13, %s18_s13 }
   0xb   :  { %p241_p3 = scmp.ne.s32.totalorder %s18_s13, %s240_s23  ;;  %p246_p5 = scmp.lt.s32.totalorder %s240_s23, %s240_s23 }
   0xd   :  { %p247_p6 = por %p246_p5, %p245_p4 }
   0xf   :  { %p248_p7 = pnand %p247_p6, %p241_p3 }
  0x11   :  { %251 = shalt.err (!%p248_p7)
}
  0x12   :  { %20 = dma.hbm_to_vmem [thread:$0]  %s379_s0, 128, %s18_s13, [#allocation3]  }
  0x13   :  { %s252_s28 = scalar_lea.hbm %s380_s1, 768 }
  0x14   :  { %p253_p8 = scmp.ne.s32.totalorder %s380_s1, %s252_s28  ;;  %p256_p9 = scmp.lt.u32.totalorder %s252_s28, %s380_s1 }
  0x16   :  { %p258_p10 = pnand %p256_p9, %p253_p8 }
  0x18   :  { %261 = shalt.err (!%p258_p10)
}
  0x19   :  { %s262_s6 = scalar_lea.vmem %s333_s15, 768  ;;  %p267_p12 = scmp.lt.s32.totalorder %s333_s15, %s333_s15 }
  0x1a   :  { %p263_p11 = scmp.ne.s32.totalorder %s333_s15, %s262_s6  ;;  %p268_p13 = scmp.lt.s32.totalorder %s262_s6, %s262_s6 }
  0x1c   :  { %p269_p0 = por %p268_p13, %p267_p12 }
  0x1e   :  { %p270_p1 = pnand %p269_p0, %p263_p11 }
  0x20   :  { %273 = shalt.err (!%p270_p1)
}
  0x21   :  { %s304_s0 = smov 128   ;;  %s305_s7 = smov 8  }
  0x22   :  { %32 = dma.hbm_to_vmem [thread:$0]  %s380_s1, 768, %s333_s15, [#allocation6], %s304_s0, %s304_s0, %s305_s7  }
  0x23   :  { %296 = dma.done.wait [#allocation3], 128  }
  0x24   :  { %297 = vsyncadd [#allocation3], 4294967168 }
  0x25   :  { %298 = dma.done.wait [#allocation6], 768  }
  0x26   :  { %299 = vsyncadd [#allocation6], 4294966528  ;;  %v306_v0 = vmov 0.0|0.0   ;;  %vm307_vm0 = vmmov 0   ;;  %v308_v1 = vmov 0.0   ;;  %v42_v2 = vld [vmem:[#allocation5] sm:$0xff] }
  0x27   :  { %204 = vmatprep.subr.bf16.mxu0 %v306_v0  ;;  %201 = vmatprep.mubr.msk.f32.mxu0 %vm307_vm0, %v308_v1  ;;  %v43_v3 = vld [vmem:[#allocation5 + $0x8] sm:$0xff]  ;;  %v44_v4 = vld [vmem:[#allocation5 + $0x10] sm:$0xff]  ;;  %v45_v6 = vld [vmem:[#allocation5 + $0x18] sm:$0xff]  ;;  %vm55_vm1 = vcmask 392192   ;;  %s309_s11 = smov 32   ;;  %s310_s12 = smov 64  }
  0x28   :  { %v205_v5 = vpack.c.bf16 %v43_v3, %v42_v2  ;;  %v208_v7 = vpack.c.bf16 %v45_v6, %v44_v4  ;;  %v46_v8 = vld [vmem:[#allocation5 + $0x20] sm:$0xff]  ;;  %v47_v9 = vld [vmem:[#allocation5 + $0x28] sm:$0xff]  ;;  %v41_v11 = vld [vmem:[#allocation2] sm:$0xff]  ;;  %s312_s13 = smov [#allocation7]   ;;  %vm161_vm2 = vcmask 261120  }
  0x29   :  { %v211_v10 = vpack.c.bf16 %v47_v9, %v46_v8  ;;  %v179_v12 = vld [vmem:[%s381_s2] ss:$0 sm:$0xff]  ;;  %s311_s2 = smov 96   ;;  %s169_s14 = sshll.u32 %s312_s13, 4  ;;  %s170_s14 = int_to_ptr.vmem [resolvable:$true] %s169_s14 }
  0x2a   :  { %206 = vmatpush3.bf16.msra.mxu0 %v205_v5  ;;  %s274_s15 = scalar_lea.vmem %s170_s14, 128  ;;  %p279_p3 = scmp.lt.s32.totalorder %s170_s14, %s170_s14 }
  0x2b   :  { %207 = vmatprep.subr.bf16.mxu0 %v306_v0  ;;  %p275_p2 = scmp.ne.s32.totalorder %s170_s14, %s274_s15  ;;  %p280_p4 = scmp.lt.s32.totalorder %s274_s15, %s274_s15 }
  0x2d   :  { %p281_p5 = por %p280_p4, %p279_p3 }
  0x2e   :  { %209 = vmatpush3.bf16.msra.mxu0 %v208_v7 }
  0x2f   :  { %210 = vmatprep.subr.bf16.mxu0 %v306_v0  ;;  %p282_p6 = pnand %p281_p5, %p275_p2 }
  0x32   :  { %212 = vmatpush3.bf16.msra.mxu0 %v211_v10 }
  0x35   :  { %202 = vmatmul.mubr.msk.f32.vlgmr.msra.gmra.mrb[0].mxu0 %vm55_vm1, %v41_v11 }
 0x108   :  { %v125_v13 = vpop.f32.mrb[0].mxu0 }
 0x109   :  { %v126_v14 = vadd.f32 %v179_v12, %v125_v13  ;;  %v203_v15 = vpop.f32.mrb[1].mxu0 }
 0x10b   :  { %136 = vrot.lane.b32.xlu0 %v126_v14, %s309_s11  ;;  %v181_v16 = vmul.f32 -1.442695, %v126_v14 }
 0x10d   :  { %224 = vpow2.f32 %v181_v16 }
 0x117   :  { %v225_v17 = vpop.eup %224 }
 0x118   :  { %v132_v18 = vadd.f32 1.0, %v225_v17 }
 0x11a   :  { %226 = vrcp.f32 %v132_v18 }
 0x124   :  { %v227_v19 = vpop.eup %226 }
 0x125   :  { %v146_v26 = vsub.f32 1.0, %v227_v19 }
 0x17d   :  { %v137_v20 = vpop.permute.xlu0 %136 }
 0x17e   :  { %v139_v21 = vmul.f32 %v227_v19, %v137_v20 }
 0x180   :  { %141 = vrot.lane.b32.xlu0 %v139_v21, %s310_s12 }
 0x1f2   :  { %v142_v22 = vpop.permute.xlu0 %141 }
 0x1f3   :  { %v144_v23 = vadd.f32 %v142_v22, %v126_v14 }
 0x1f5   :  { %228 = vtanh.f32 %v144_v23 }
 0x1ff   :  { %v229_v24 = vpop.eup %228 }
 0x200   :  { %148 = vrot.lane.b32.xlu1 %v229_v24, %s311_s2 }
 0x204   :  { %152 = vrot.lane.b32.xlu1 %v41_v11, %s309_s11 }
 0x272   :  { %v149_v25 = vpop.permute.xlu1 %148 }
 0x273   :  { %v151_v28 = vmul.f32 %v149_v25, %v146_v26 }
 0x276   :  { %v153_v27 = vpop.permute.xlu1 %152 }
 0x277   :  { %v155_v29 = vmul.f32 %v227_v19, %v153_v27 }
 0x279   :  { %v156_v30 = vadd.f32 %v155_v29, %v151_v28 }
 0x27b   :  { %158 = vrot.lane.b32.xlu0 %v156_v30, %s311_s2 }
 0x2ed   :  { %v159_v31 = vpop.permute.xlu0 %158 }
 0x2ee   :  { %162 = vst.msk [vmem:[#allocation7] sm:$0xff] %vm161_vm2, %v159_v31 }
 0x2ef   :  { %285 = shalt.err (!%p282_p6)
}
 0x2f0   :  { %s286_s18 = scalar_lea.hbm %s382_s3, 128 }
 0x2f1   :  { %p287_p7 = scmp.ne.s32.totalorder %s382_s3, %s286_s18  ;;  %p290_p8 = scmp.lt.u32.totalorder %s286_s18, %s382_s3 }
 0x2f3   :  { %p292_p9 = pnand %p290_p8, %p287_p7 }
 0x2f5   :  { %295 = shalt.err (!%p292_p9)
}
 0x2f6   :  { %172 = dma.vmem_to_hbm [thread:$0]  %s170_s14, 128, %s382_s3, [#allocation4]  }
 0x2f7   :  { %300 = dma.done.wait [#allocation4], 128  }
 0x2f8   :  { %301 = vsyncadd [#allocation4], 4294967168 }
 0x2f9   :  { %176 = vsyncpa [#allocation3], 1 }
 0x2fa   :  { %177 = vsyncpa [#allocation6], 1 }
 0x2fb   :  { %178 = vsyncpa [#allocation4], 1 }

</bundles_post_ra>
